<compile_context>
chip_gen: v7x
topology: tpu7x:2x2x1
jax: 0.10.0
libtpu: 0.0.40
codegen_flags: <defaults>
</compile_context>

<pallas_src>
import jax
import jax.numpy as jnp
from jax.experimental import pallas as pl
from jax.experimental.pallas import tpu as pltpu


_LANE = 128              # batch tile must be a multiple of the lane width
_DEFAULT_TILE = 16384    # rows (lanes) per grid step; sweep 8192-32768
_MIN_GRID_STEPS = 2      # keep >=2 steps so v7x's 2nd TC / the pipeline has work


def _round_up(a, b):
    return ((a + b - 1) // b) * b


def _mlp_kernel(xT_ref, w1_ref, w2_ref, b2_ref, w3_ref, b3_ref, out_ref):
    xT = xT_ref[...]                                   # [KP, T] bf16, batch on lanes

    # Layer 1 (+ fused bias via the 1.0 feature row): [H, KP] @ [KP, T] -> [H, T] f32.
    h1 = jnp.dot(w1_ref[...], xT, preferred_element_type=jnp.float32)
    h1 = jnp.maximum(h1, 0.0)

    # Layer 2: [H, H] @ [H, T] -> [H, T], bias + ReLU in f32.
    h2 = jnp.dot(w2_ref[...], h1.astype(jnp.bfloat16),
                 preferred_element_type=jnp.float32) + b2_ref[...]
    h2 = jnp.maximum(h2, 0.0)

    # Layer 3 (out_features = 1): VPU multiply + cross-sublane reduce (XLU),
    # kept off the MXU.  w3 is a [H, 1] f32 column, b3 an SMEM scalar.
    logits = jnp.sum(h2 * w3_ref[...], axis=0, keepdims=True) + b3_ref[0]   # [1, T]

    out_ref[...] = jax.nn.sigmoid(logits)              # lane-dense [1, T] f32 store


def line_association_forward(x, params, tile=_DEFAULT_TILE):
    """x: [B, input_dim] float32 -> [B] float32 probabilities.

    params in PyTorch nn.Linear layout: (w1[H,in], b1[H], w2[H,H], b2[H],
    w3[1,H], b3[1]).
    """
    w1, b1, w2, b2, w3, b3 = params
    B, in_dim = x.shape
    H = w1.shape[0]

    # --- batch tiling -------------------------------------------------------
    tile = max(_LANE, (int(tile) // _LANE) * _LANE)
    B_lane = _round_up(B, _LANE)
    # Cap T so there are at least _MIN_GRID_STEPS grid steps when possible.
    t_cap = max(_LANE, (B_lane // (_MIN_GRID_STEPS * _LANE)) * _LANE)
    T = min(tile, t_cap)
    n_steps = pl.cdiv(B_lane, T)
    B_pad = n_steps * T

    # Feature padding: +1 constant-1.0 row carries b1 through the layer-1 matmul,
    # then round up to a clean sublane multiple of 8.
    KP = _round_up(in_dim + 1, 8)

    # --- wrapper-side layout plumbing (single fused cast+concat+transpose+pad) ---
    x_aug = jnp.concatenate(
        [x.astype(jnp.bfloat16), jnp.ones((B, 1), jnp.bfloat16)], axis=1)  # [B, in+1]
    if KP > in_dim + 1:
        x_aug = jnp.pad(x_aug, ((0, 0), (0, KP - in_dim - 1)))
    xT = jnp.pad(x_aug.T, ((0, 0), (0, B_pad - B)))                        # [KP, B_pad]

    w1p = jnp.concatenate(
        [w1.astype(jnp.bfloat16), b1.astype(jnp.bfloat16)[:, None],
         jnp.zeros((H, KP - in_dim - 1), jnp.bfloat16)], axis=1)           # [H, KP]
    w2b = w2.astype(jnp.bfloat16)                      # [H, H]  bf16
    b2c = b2.astype(jnp.float32).reshape(H, 1)         # [H, 1]  f32
    w3c = w3.astype(jnp.float32).reshape(-1, 1)        # [H, 1]  f32 (VPU operand)
    b3s = b3.astype(jnp.float32).reshape(1)            # (1,)    f32 SMEM scalar

    # --- generation-aware VMEM limit ---------------------------------------
    try:
        vmem_cap = int(pltpu.get_tpu_info().vmem_capacity_bytes)
    except Exception:
        vmem_cap = 64 * 1024 * 1024                    # safe on every generation
    vmem_limit = max(32 * 1024 * 1024,
                     min((3 * vmem_cap) // 4, 96 * 1024 * 1024))

    cost = pl.CostEstimate(
        flops=2 * B_pad * (KP * H + H * H + H),        # nominal, not MXU-achievable
        transcendentals=B_pad,                         # sigmoid
        bytes_accessed=B_pad * KP * 2 + B_pad * 4
        + (KP * H + H * H) * 2 + (2 * H + 1) * 4,
    )

    out = pl.pallas_call(
        _mlp_kernel,
        out_shape=jax.ShapeDtypeStruct((1, B_pad), jnp.float32),
        grid=(n_steps,),
        in_specs=[
            pl.BlockSpec((KP, T), lambda i: (0, i)),             # xT: streamed per tile
            pl.BlockSpec((H, KP), lambda i: (0, 0)),             # w1 (+b1): VMEM-resident
            pl.BlockSpec((H, H), lambda i: (0, 0)),              # w2
            pl.BlockSpec((H, 1), lambda i: (0, 0)),              # b2
            pl.BlockSpec((H, 1), lambda i: (0, 0)),              # w3 column
            pl.BlockSpec(memory_space=pltpu.MemorySpace.SMEM),   # b3 scalar
        ],
        out_specs=pl.BlockSpec((1, T), lambda i: (0, i)),        # lane-dense output
        compiler_params=pltpu.CompilerParams(
            dimension_semantics=("parallel",),                   # v7x: 2 TCs share grid
            vmem_limit_bytes=vmem_limit,
        ),
        cost_estimate=cost,
    )(xT, w1p, w2b, b2c, w3c, b3s)

    return out[0, :B]                                            # squeeze(1) -> [B]


def init_params(key, input_dim=7, hidden_dim=64):
    """nn.Linear-style init, PyTorch layout: W [out, in], b [out]."""
    ks = jax.random.split(key, 6)

    def lin(kw, kb, fan_in, fan_out):
        bound = 1.0 / float(fan_in) ** 0.5
        w = jax.random.uniform(kw, (fan_out, fan_in), jnp.float32, -bound, bound)
        b = jax.random.uniform(kb, (fan_out,), jnp.float32, -bound, bound)
        return w, b

    w1, b1 = lin(ks[0], ks[1], input_dim, hidden_dim)
    w2, b2 = lin(ks[2], ks[3], hidden_dim, hidden_dim)
    w3, b3 = lin(ks[4], ks[5], hidden_dim, 1)
    return (w1, b1, w2, b2, w3, b3)


def _reference(x, params):
    """Plain-JAX reference mirroring the kernel's precision (bf16 MXU, f32 acc,
    bf16 b1 via the fused bias row)."""
    w1, b1, w2, b2, w3, b3 = params
    xT = x.T.astype(jnp.bfloat16)
    h1 = jnp.maximum(
        jnp.dot(w1.astype(jnp.bfloat16), xT, preferred_element_type=jnp.float32)
        + b1.astype(jnp.bfloat16).astype(jnp.float32)[:, None], 0.0)
    h2 = jnp.maximum(
        jnp.dot(w2.astype(jnp.bfloat16), h1.astype(jnp.bfloat16),
                preferred_element_type=jnp.float32) + b2[:, None], 0.0)
    logits = jnp.sum(h2 * w3.reshape(-1, 1), axis=0) + b3[0]
    return jax.nn.sigmoid(logits)


if __name__ == "__main__":
    key = jax.random.PRNGKey(0)
    k_param, k_x = jax.random.split(key)

    INPUT_DIM, HIDDEN_DIM = 7, 64
    params = init_params(k_param, INPUT_DIM, HIDDEN_DIM)

    # B=8: single-step grid.  B=300: multi-step grid (T=128, 3 steps) + batch tail.
    for B in (8, 300):
        k_x, sub = jax.random.split(k_x)
        x = jax.random.normal(sub, (B, INPUT_DIM), dtype=jnp.float32)

        probs = jax.block_until_ready(line_association_forward(x, params))
        ref = _reference(x, params)

        assert probs.shape == (B,), (probs.shape, B)
        assert jnp.allclose(probs, ref, atol=2e-3, rtol=2e-3), (B, probs, ref)

    print("KERNEL_OK")
</pallas_src>

<mosaic_0001>
module attributes {stable_mosaic.version = 11 : i64} {
  func.func @_mlp_kernel(%arg0: i32, %arg1: memref<8x128xbf16, #tpu.memory_space<vmem>>, %arg2: memref<64x8xbf16, #tpu.memory_space<vmem>>, %arg3: memref<64x64xbf16, #tpu.memory_space<vmem>>, %arg4: memref<64x1xf32, #tpu.memory_space<vmem>>, %arg5: memref<64x1xf32, #tpu.memory_space<vmem>>, %arg6: memref<1xf32, #tpu.memory_space<smem>>, %arg7: memref<1x128xf32, #tpu.memory_space<vmem>>) attributes {dimension_semantics = [#tpu.dimension_semantics<parallel>], iteration_bounds = array<i64: 1>, scalar_prefetch = 0 : i64, scratch_operands = 0 : i64, tpu.core_type = #tpu.core_type<tc>, window_params = [{transform_indices = @transform_0, window_bounds = array<i64: 8, 128>}, {pipeline_mode = #tpu.pipeline_mode<synchronous>, transform_indices = @transform_1, window_bounds = array<i64: 64, 8>}, {pipeline_mode = #tpu.pipeline_mode<synchronous>, transform_indices = @transform_2, window_bounds = array<i64: 64, 64>}, {pipeline_mode = #tpu.pipeline_mode<synchronous>, transform_indices = @transform_3, window_bounds = array<i64: 64, 1>}, {pipeline_mode = #tpu.pipeline_mode<synchronous>, transform_indices = @transform_4, window_bounds = array<i64: 64, 1>}, {transform_indices = @transform_5, window_bounds = array<i64: 1>}, {transform_indices = @transform_6, window_bounds = array<i64: 1, 128>}]} {
    %c0 = arith.constant 0 : index
    %c0_0 = arith.constant 0 : index
    %0 = vector.load %arg1[%c0, %c0_0] : memref<8x128xbf16, #tpu.memory_space<vmem>>, vector<8x128xbf16>
    %c0_1 = arith.constant 0 : index
    %c0_2 = arith.constant 0 : index
    %1 = vector.load %arg2[%c0_1, %c0_2] : memref<64x8xbf16, #tpu.memory_space<vmem>>, vector<64x8xbf16>
    %cst = arith.constant dense<0.000000e+00> : vector<64x128xf32>
    %2 = tpu.matmul %1, %0, %cst {dimension_numbers = #tpu.dot_dimension_numbers<[1], [0], [0], [1], [0, 0, 1, 1], [], []>} : vector<64x8xbf16>, vector<8x128xbf16>, vector<64x128xf32> -> vector<64x128xf32>
    %cst_3 = arith.constant 0.000000e+00 : f32
    %3 = vector.broadcast %cst_3 : f32 to vector<64x128xf32>
    %4 = arith.maximumf %2, %3 : vector<64x128xf32>
    %c0_4 = arith.constant 0 : index
    %c0_5 = arith.constant 0 : index
    %5 = vector.load %arg3[%c0_4, %c0_5] : memref<64x64xbf16, #tpu.memory_space<vmem>>, vector<64x64xbf16>
    %6 = arith.truncf %4 : vector<64x128xf32> to vector<64x128xbf16>
    %cst_6 = arith.constant dense<0.000000e+00> : vector<64x128xf32>
    %7 = tpu.matmul %5, %6, %cst_6 {dimension_numbers = #tpu.dot_dimension_numbers<[1], [0], [0], [1], [0, 0, 1, 1], [], []>} : vector<64x64xbf16>, vector<64x128xbf16>, vector<64x128xf32> -> vector<64x128xf32>
    %c0_7 = arith.constant 0 : index
    %c0_8 = arith.constant 0 : index
    %8 = vector.load %arg4[%c0_7, %c0_8] : memref<64x1xf32, #tpu.memory_space<vmem>>, vector<64x1xf32>
    %9 = vector.broadcast %8 : vector<64x1xf32> to vector<64x128xf32>
    %10 = arith.addf %7, %9 : vector<64x128xf32>
    %cst_9 = arith.constant 0.000000e+00 : f32
    %11 = vector.broadcast %cst_9 : f32 to vector<64x128xf32>
    %12 = arith.maximumf %10, %11 : vector<64x128xf32>
    %c0_10 = arith.constant 0 : index
    %c0_11 = arith.constant 0 : index
    %13 = vector.load %arg5[%c0_10, %c0_11] : memref<64x1xf32, #tpu.memory_space<vmem>>, vector<64x1xf32>
    %14 = vector.broadcast %13 : vector<64x1xf32> to vector<64x128xf32>
    %15 = arith.mulf %12, %14 : vector<64x128xf32>
    %cst_12 = arith.constant dense<0.000000e+00> : vector<128xf32>
    %16 = vector.multi_reduction <add>, %15, %cst_12 [0] : vector<64x128xf32> to vector<128xf32>
    %17 = vector.shape_cast %16 : vector<128xf32> to vector<1x128xf32>
    %c0_13 = arith.constant 0 : index
    %18 = memref.load %arg6[%c0_13] : memref<1xf32, #tpu.memory_space<smem>>
    %19 = vector.broadcast %18 : f32 to vector<1x128xf32>
    %20 = arith.addf %17, %19 : vector<1x128xf32>
    %21 = arith.negf %20 : vector<1x128xf32>
    %22 = math.exp %21 : vector<1x128xf32>
    %cst_14 = arith.constant 1.000000e+00 : f32
    %23 = vector.broadcast %cst_14 : f32 to vector<1x128xf32>
    %24 = arith.addf %23, %22 : vector<1x128xf32>
    %25 = arith.divf %23, %24 : vector<1x128xf32>
    %c0_15 = arith.constant 0 : index
    %c0_16 = arith.constant 0 : index
    %26 = vector.load %arg7[%c0_15, %c0_16] : memref<1x128xf32, #tpu.memory_space<vmem>>, vector<1x128xf32>
    tpu.vector_store %arg7[%c0_15, %c0_16], %25 {strides = array<i32>} : memref<1x128xf32, #tpu.memory_space<vmem>>, vector<1x128xf32>,
    return
  }
  func.func @transform_0(%arg0: i32) -> (i32, i32) {
    %c0_i32 = arith.constant 0 : i32
    %c0_i32_0 = arith.constant 0 : i32
    return %c0_i32, %arg0 : i32, i32
  }
  func.func @transform_1(%arg0: i32) -> (i32, i32) {
    %c0_i32 = arith.constant 0 : i32
    %c0_i32_0 = arith.constant 0 : i32
    %c0_i32_1 = arith.constant 0 : i32
    return %c0_i32, %c0_i32_0 : i32, i32
  }
  func.func @transform_2(%arg0: i32) -> (i32, i32) {
    %c0_i32 = arith.constant 0 : i32
    %c0_i32_0 = arith.constant 0 : i32
    %c0_i32_1 = arith.constant 0 : i32
    return %c0_i32, %c0_i32_0 : i32, i32
  }
  func.func @transform_3(%arg0: i32) -> (i32, i32) {
    %c0_i32 = arith.constant 0 : i32
    %c0_i32_0 = arith.constant 0 : i32
    %c0_i32_1 = arith.constant 0 : i32
    return %c0_i32, %c0_i32_0 : i32, i32
  }
  func.func @transform_4(%arg0: i32) -> (i32, i32) {
    %c0_i32 = arith.constant 0 : i32
    %c0_i32_0 = arith.constant 0 : i32
    %c0_i32_1 = arith.constant 0 : i32
    return %c0_i32, %c0_i32_0 : i32, i32
  }
  func.func @transform_5(%arg0: i32) -> i32 {
    %c0_i32 = arith.constant 0 : i32
    %c0_i32_0 = arith.constant 0 : i32
    return %c0_i32 : i32
  }
  func.func @transform_6(%arg0: i32) -> (i32, i32) {
    %c0_i32 = arith.constant 0 : i32
    %c0_i32_0 = arith.constant 0 : i32
    return %c0_i32, %arg0 : i32, i32
  }
}

</mosaic_0001>

<bundles_post_ra>
// kernel: tpu_custom_call.1
= control target key start
LH: loop header
LB: loop body
LE: loop exit
PB: predicated region body
PF: predicated region fallthrough
CT: control target
= control target key end

     0   :  { %vm68_vm0 = vcmask 1043456   ;;  %vm55_vm1 = vcmask 64512   ;;  %s640_s0 = inlined_call_operand.vmem [shape: bf16[8,128], index: 0, kind: input, shape index: {}]   ;;  %s641_s1 = inlined_call_operand.vmem [shape: bf16[64,8], index: 1, kind: input, shape index: {}]   ;;  %s642_s2 = inlined_call_operand.vmem [shape: bf16[64,64], index: 2, kind: input, shape index: {}]   ;;  %s643_s3 = inlined_call_operand.vmem [shape: f32[64,1], index: 3, kind: input, shape index: {}]   ;;  %s644_s4 = inlined_call_operand.vmem [shape: f32[64,1], index: 4, kind: input, shape index: {}]   ;;  %s645_s5 = inlined_call_operand.<no memory space> [shape: f32[1], index: 5, kind: input, shape index: {}]   ;;  %s646_s6 = inlined_call_operand.hbm [shape: f32[1,128], index: 6, kind: output, shape index: {}]  }
   0x1   :  { %v26_v0 = vld [vmem:[%s640_s0] sm:$0xf]  ;;  %v474_v3 = vld [vmem:[%s641_s1 + $0x8] sm:$0xff]   ;;  %v475_v4 = vld [vmem:[%s641_s1 + $0x10] sm:$0xff]  }
   0x2   :  { %v473_v1 = vld [vmem:[%s641_s1] sm:$0xff]   ;;  %468 = vmatprep.subr.msk.bf16.mxu0 %vm68_vm0, %v26_v0  ;;  %v70_v2 = vsel %vm68_vm0, %v26_v0, 0 }
   0x3   :  { %435 = vmatpush3.bf16.msra.mxu0 %v70_v2  ;;  %436 = vmatprep.mubr.msk.bf16.mxu0 %vm55_vm1, %v473_v1 }
   0x6   :  { %437 = vmatmul.mubr.msk.bf16.vlgmr.msra.gmra.mrb[0].mxu0 %vm55_vm1, %v474_v3 }
   0x7   :  { %440 = vmatprep.mubr.msk.bf16.mxu0 %vm55_vm1, %v475_v4 }
   0x8   :  { %12 = vsyncpa [#allocation4], 0  ;;  %v476_v5 = vld [vmem:[%s641_s1 + $0x18] sm:$0xff]   ;;  %v477_v6 = vld [vmem:[%s642_s2] sm:$0xff]   ;;  %vm225_vm2 = vcmask 523264   ;;  %v509_v10 = vmov 0  }
   0x9   :  { %v478_v7 = vld [vmem:[%s642_s2 + $0x10] sm:$0xff]   ;;  %v157_v8 = vld [vmem:[%s643_s3] sm:$0xff]  ;;  %471 = vset.pattern.permute.xlu0 %v509_v10  ;;  %472 = vset.pattern.permute.xlu1 %v509_v10  ;;  %v158_v11 = vld [vmem:[%s643_s3 + $0x8] sm:$0xff]  ;;  %s510_s18 = smov [#allocation3]  }
   0xa   :  { %456 = vmatprep.mubr.msk.bf16.mxu1 %vm225_vm2, %v478_v7  ;;  %v159_v9 = vld [vmem:[%s643_s3 + $0x10] sm:$0xff]  ;;  %167 = vperm.xlu0 %471, %v157_v8   ;;  %v160_v12 = vld [vmem:[%s643_s3 + $0x18] sm:$0xff]  ;;  %v311_v13 = vld [vmem:[%s644_s4] sm:$0xff]  ;;  %s396_s19 = sshll.u32 %s510_s18, 4  ;;  %s397_s19 = int_to_ptr.vmem [resolvable:$true] %s396_s19 }
   0xb   :  { %177 = vperm.xlu1 %472, %v159_v9   ;;  %v312_v14 = vld [vmem:[%s644_s4 + $0x8] sm:$0xff]  ;;  %v161_v15 = vld [vmem:[%s643_s3 + $0x20] sm:$0xff]  ;;  %v313_v16 = vld [vmem:[%s644_s4 + $0x10] sm:$0xff]  ;;  %s485_s20 = scalar_lea.vmem %s397_s19, 16  ;;  %s489_s21 = scalar_lea.vmem %s397_s19, 32 }
   0xc   :  { %v162_v17 = vld [vmem:[%s643_s3 + $0x28] sm:$0xff]  ;;  %v314_v18 = vld [vmem:[%s644_s4 + $0x18] sm:$0xff]  ;;  %v163_v19 = vld [vmem:[%s643_s3 + $0x30] sm:$0xff]  ;;  %p486_p0 = scmp.ne.s32.totalorder %s397_s19, %s485_s20  ;;  %p490_p1 = scmp.lt.s32.totalorder %s397_s19, %s397_s19 }
   0xd   :  { %v315_v20 = vld [vmem:[%s644_s4 + $0x20] sm:$0xff]  ;;  %v164_v21 = vld [vmem:[%s643_s3 + $0x38] sm:$0xff]  ;;  %v316_v22 = vld [vmem:[%s644_s4 + $0x28] sm:$0xff]  ;;  %p491_p2 = scmp.lt.s32.totalorder %s489_s21, %s485_s20 }
   0xe   :  { %441 = vmatmul.mubr.msk.bf16.gmra.mrb[4].mxu0 %vm55_vm1, %v476_v5  ;;  %172 = vperm.xlu0 %471, %v158_v11   ;;  %v317_v23 = vld [vmem:[%s644_s4 + $0x30] sm:$0xff]  ;;  %v318_v24 = vld [vmem:[%s644_s4 + $0x38] sm:$0xff]  ;;  %v479_v45 = vld [vmem:[%s642_s2 + $0x8] sm:$0xff]  }
   0xf   :  { %452 = vmatprep.mubr.msk.bf16.mxu0 %vm225_vm2, %v477_v6  ;;  %182 = vperm.xlu1 %472, %v160_v12   ;;  %v480_v46 = vld [vmem:[%s642_s2 + $0x18] sm:$0xff]   ;;  %p492_p3 = por %p491_p2, %p490_p1 }
  0x11   :  { %p493_p4 = pnand %p492_p3, %p486_p0 }
  0x12   :  { %321 = vperm.xlu0 %471, %v311_v13  }
  0x13   :  { %326 = vperm.xlu1 %472, %v312_v14  }
  0x16   :  { %187 = vperm.xlu0 %471, %v161_v15  }
  0x17   :  { %331 = vperm.xlu1 %472, %v313_v16  }
  0x1a   :  { %192 = vperm.xlu0 %471, %v162_v17  }
  0x1b   :  { %336 = vperm.xlu1 %472, %v314_v18  }
  0x1e   :  { %197 = vperm.xlu0 %471, %v163_v19  }
  0x1f   :  { %341 = vperm.xlu1 %472, %v315_v20  }
  0x22   :  { %202 = vperm.xlu0 %471, %v164_v21  }
  0x23   :  { %346 = vperm.xlu1 %472, %v316_v22  }
  0x26   :  { %351 = vperm.xlu0 %471, %v317_v23  }
  0x27   :  { %356 = vperm.xlu1 %472, %v318_v24  }
  0x89   :  { %v168_v47 = vpop.permute.xlu0 %167 }
  0x8a   :  { %v178_v48 = vpop.permute.xlu1 %177 }
  0x8d   :  { %v173_v49 = vpop.permute.xlu0 %172 }
  0x8e   :  { %v183_v50 = vpop.permute.xlu1 %182 }
  0x91   :  { %v322_v51 = vpop.permute.xlu0 %321 }
  0x92   :  { %v327_v52 = vpop.permute.xlu1 %326 }
  0x95   :  { %v188_v53 = vpop.permute.xlu0 %187 }
  0x96   :  { %v332_v54 = vpop.permute.xlu1 %331 }
  0x99   :  { %v193_v55 = vpop.permute.xlu0 %192 }
  0x9a   :  { %v337_v56 = vpop.permute.xlu1 %336 }
  0x9d   :  { %v198_v6 = vpop.permute.xlu0 %197 }
  0x9e   :  { %v342_v10 = vpop.permute.xlu1 %341 }
  0xa1   :  { %v203_v19 = vpop.permute.xlu0 %202 }
  0xa2   :  { %v347_v24 = vpop.permute.xlu1 %346 }
  0xd9   :  { %v438_v25 = vpop.f32.mrb[0].mxu0 }
  0xda   :  { %v106_v26 = vpop.f32.mrb[1].mxu0  ;;  %v139_v28 = vmax.f32 %v438_v25, 0.0 }
  0xdb   :  { %v439_v27 = vpop.f32.mrb[2].mxu0  ;;  %v137_v31 = vmax.f32 %v106_v26, 0.0 }
  0xdc   :  { %v140_v29 = vmax.f32 %v439_v27, 0.0  ;;  %v109_v30 = vpop.f32.mrb[3].mxu0 }
  0xdd   :  { %v138_v32 = vmax.f32 %v109_v30, 0.0 }
  0xde   :  { %v154_v33 = vpack.c.bf16 %v140_v29, %v139_v28 }
  0xdf   :  { %v153_v34 = vpack.c.bf16 %v138_v32, %v137_v31  ;;  %v352_v31 = vpop.permute.xlu0 %351 }
  0xe1   :  { %v442_v35 = vpop.f32.mrb[4].mxu0  ;;  %444 = vmatprep.subr.bf16.mxu0 %v153_v34  ;;  %460 = vmatprep.subr.bf16.mxu1 %v153_v34 }
  0xe2   :  { %v122_v36 = vpop.f32.mrb[5].mxu0  ;;  %445 = vmatpush3.bf16.msra.mxu0 %v153_v34  ;;  %464 = vmatpush3.bf16.msra.mxu1 %v153_v34  ;;  %v143_v38 = vmax.f32 %v442_v35, 0.0  ;;  %v357_v34 = vpop.permute.xlu1 %356 }
  0xe3   :  { %v443_v37 = vpop.f32.mrb[6].mxu0  ;;  %446 = vmatprep.subr.bf16.mxu0 %v154_v33  ;;  %461 = vmatprep.subr.bf16.mxu1 %v154_v33  ;;  %v141_v41 = vmax.f32 %v122_v36, 0.0 }
  0xe4   :  { %v144_v39 = vmax.f32 %v443_v37, 0.0  ;;  %v125_v40 = vpop.f32.mrb[7].mxu0 }
  0xe5   :  { %v142_v42 = vmax.f32 %v125_v40, 0.0 }
  0xe6   :  { %v156_v43 = vpack.c.bf16 %v144_v39, %v143_v38  ;;  %447 = vmatpush3.bf16.msra.mxu0 %v154_v33  ;;  %465 = vmatpush3.bf16.msra.mxu1 %v154_v33 }
  0xe7   :  { %v155_v44 = vpack.c.bf16 %v142_v42, %v141_v41 }
  0xe9   :  { %448 = vmatprep.subr.bf16.mxu0 %v155_v44  ;;  %462 = vmatprep.subr.bf16.mxu1 %v155_v44 }
  0xea   :  { %449 = vmatpush3.bf16.msra.mxu0 %v155_v44  ;;  %466 = vmatpush3.bf16.msra.mxu1 %v155_v44 }
  0xeb   :  { %450 = vmatprep.subr.bf16.mxu0 %v156_v43  ;;  %463 = vmatprep.subr.bf16.mxu1 %v156_v43 }
  0xee   :  { %451 = vmatpush3.bf16.msra.mxu0 %v156_v43  ;;  %467 = vmatpush3.bf16.msra.mxu1 %v156_v43  ;;  %v381_v43 = vstv %s645_s5 }
  0xf1   :  { %453 = vmatmul.mubr.msk.bf16.vlgmr.msra.gmra.mrb[8].mxu0 %vm225_vm2, %v479_v45  ;;  %457 = vmatmul.mubr.msk.bf16.vlgmr.msra.gmra.mrb[0].mxu1 %vm225_vm2, %v480_v46 }
 0x1c4   :  { %v454_v57 = vpop.f32.mrb[8].mxu0  ;;  %v458_v58 = vpop.f32.mrb[0].mxu1 }
 0x1c5   :  { %v272_v59 = vpop.f32.mrb[9].mxu0  ;;  %v288_v60 = vpop.f32.mrb[1].mxu1  ;;  %v281_v61 = vadd.f32 %v454_v57, %v178_v48  ;;  %v297_v16 = vadd.f32 %v458_v58, %v198_v6 }
 0x1c6   :  { %v273_v62 = vadd.f32 %v272_v59, %v168_v47  ;;  %v455_v63 = vpop.f32.mrb[10].mxu0  ;;  %v459_v0 = vpop.f32.mrb[2].mxu1  ;;  %v289_v8 = vadd.f32 %v288_v60, %v188_v53 }
 0x1c7   :  { %v275_v1 = vpop.f32.mrb[11].mxu0  ;;  %v291_v2 = vpop.f32.mrb[3].mxu1  ;;  %v284_v4 = vadd.f32 %v455_v63, %v183_v50  ;;  %v305_v7 = vmax.f32 %v281_v61, 0.0  ;;  %v300_v21 = vadd.f32 %v459_v0, %v203_v19  ;;  %v309_v25 = vmax.f32 %v297_v16, 0.0 }
 0x1c8   :  { %v303_v3 = vmax.f32 %v273_v62, 0.0  ;;  %v276_v5 = vadd.f32 %v275_v1, %v173_v49  ;;  %v292_v14 = vadd.f32 %v291_v2, %v193_v55  ;;  %v307_v17 = vmax.f32 %v289_v8, 0.0 }
 0x1c9   :  { %v306_v12 = vmax.f32 %v284_v4, 0.0  ;;  %v361_v15 = vmul.f32 %v332_v54, %v305_v7  ;;  %v310_v28 = vmax.f32 %v300_v21, 0.0  ;;  %v365_v32 = vmul.f32 %v352_v31, %v309_v25 }
 0x1ca   :  { %v304_v9 = vmax.f32 %v276_v5, 0.0  ;;  %v359_v11 = vmul.f32 %v322_v51, %v303_v3  ;;  %v308_v23 = vmax.f32 %v292_v14, 0.0  ;;  %v363_v26 = vmul.f32 %v342_v10, %v307_v17 }
 0x1cb   :  { %v362_v20 = vmul.f32 %v337_v56, %v306_v12  ;;  %v366_v35 = vmul.f32 %v357_v34, %v310_v28 }
 0x1cc   :  { %v360_v13 = vmul.f32 %v327_v52, %v304_v9  ;;  %v364_v29 = vmul.f32 %v347_v24, %v308_v23 }
 0x1ce   :  { %v367_v18 = vadd.f32 %v360_v13, %v359_v11 }
 0x1d0   :  { %v368_v22 = vadd.f32 %v367_v18, %v361_v15 }
 0x1d2   :  { %v369_v27 = vadd.f32 %v368_v22, %v362_v20 }
 0x1d4   :  { %v370_v30 = vadd.f32 %v369_v27, %v363_v26 }
 0x1d6   :  { %v371_v33 = vadd.f32 %v370_v30, %v364_v29 }
 0x1d8   :  { %v372_v36 = vadd.f32 %v371_v33, %v365_v32 }
 0x1da   :  { %v373_v37 = vadd.f32 %v372_v36, %v366_v35 }
 0x1dc   :  { %v374_v38 = vrot.slane %v373_v37, 4 }
 0x1de   :  { %v375_v39 = vadd.f32 %v374_v38, %v373_v37 }
 0x1e0   :  { %v376_v40 = vrot.slane %v375_v39, 2 }
 0x1e2   :  { %v377_v41 = vadd.f32 %v376_v40, %v375_v39 }
 0x1e4   :  { %v378_v42 = vrot.slane %v377_v41, 1 }
 0x1e6   :  { %v379_v44 = vadd.f32 %v378_v42, %v377_v41 }
 0x1e8   :  { %v382_v45 = vadd.f32 %v381_v43, %v379_v44 }
 0x1ea   :  { %v420_v46 = vmul.f32 -1.442695, %v382_v45 }
 0x1ec   :  { %481 = vpow2.f32 %v420_v46 }
 0x1f6   :  { %v482_v47 = vpop.eup %481 }
 0x1f7   :  { %v386_v48 = vadd.f32 1.0, %v482_v47 }
 0x1f9   :  { %483 = vrcp.f32 %v386_v48 }
 0x203   :  { %v484_v49 = vpop.eup %483 }
 0x204   :  { %389 = vst [vmem:[#allocation3] sm:$0x1] %v484_v49 }
 0x205   :  { %496 = shalt.err (!%p493_p4)
}
 0x206   :  { %s497_s23 = scalar_lea.hbm %s646_s6, 16 }
 0x207   :  { %p498_p5 = scmp.ne.s32.totalorder %s646_s6, %s497_s23  ;;  %p501_p6 = scmp.lt.u32.totalorder %s497_s23, %s646_s6 }
 0x209   :  { %p503_p7 = pnand %p501_p6, %p498_p5 }
 0x20b   :  { %506 = shalt.err (!%p503_p7)
}
 0x20c   :  { %399 = dma.vmem_to_hbm [thread:$0]  %s397_s19, 16, %s646_s6, [#allocation4]  }
 0x20d   :  { %507 = dma.done.wait [#allocation4], 16  }
 0x20e   :  { %508 = vsyncadd [#allocation4], 4294967280 }
 0x20f   :  { %403 = vsyncpa [#allocation4], 1 }

</bundles_post_ra>
